<compile_context>
chip_gen: v7x
topology: tpu7x:2x2x1
jax: 0.10.0
libtpu: 0.0.40
codegen_flags: <defaults>
</compile_context>

<pallas_src>
import math

import jax
import jax.numpy as jnp
from jax.experimental import pallas as pl
from jax.experimental.pallas import tpu as pltpu


# ---------------------------------------------------------------------------
# Kernels
# ---------------------------------------------------------------------------
def _outer_softmax_kernel(wh_ref, ww_ref, out_ref):
    """local_dim=None tile.

    wh_ref : (R, TLH, 1)  f32
    ww_ref : (R, 1,  Lw)  f32
    out_ref: (R, TLH, Lw) out_dtype
    """
    wh = wh_ref[...]
    ww = ww_ref[...]
    # Separable, numerically-stable softmax over the rank axis (axis 0):
    #   softmax_r(wh + ww) = ea * eb / sum_r(ea * eb)
    # with ea = exp(wh - max_r wh), eb = exp(ww - max_r ww)  (both <= 1, no overflow).
    ea = jnp.exp(wh - jnp.max(wh, axis=0, keepdims=True))    # (R, TLH, 1)  small exp
    eb = jnp.exp(ww - jnp.max(ww, axis=0, keepdims=True))    # (R, 1, Lw)   small exp
    z = ea * eb                                              # (R, TLH, Lw) VPU mul
    s = jnp.sum(z, axis=0, keepdims=True)                    # (1, TLH, Lw) R-1 VPU adds
    inv = pl.reciprocal(s, approx=False)                     # one divide per (h, w)
    out_ref[...] = (z * inv).astype(out_ref.dtype)           # VPU mul + store


def _rank_softmax_kernel(w_ref, out_ref):
    """local_dim=0/1: softmax over axis 0 of a tiny (R, L) slab, L on the lane axis."""
    w = w_ref[...]
    e = jnp.exp(w - jnp.max(w, axis=0, keepdims=True))
    s = jnp.sum(e, axis=0, keepdims=True)
    out_ref[...] = (e * pl.reciprocal(s, approx=False)).astype(out_ref.dtype)


# ---------------------------------------------------------------------------
# Tile sizing / VMEM budgeting
# ---------------------------------------------------------------------------
_TARGET_OUT_TILE_BYTES = 16 << 20     # past this, the ~0.35us/step overhead is <1%


def _round_up(x, m):
    return ((x + m - 1) // m) * m


def _sublane_multiple(out_dtype):
    """Legal Lh-tile multiple for the out block's sublane axis (packed dtypes pack rows)."""
    out_bytes = jnp.dtype(out_dtype).itemsize
    return max(8, 8 * (4 // max(out_bytes, 1)))   # f32 -> 8, bf16 -> 16, int8/fp8 -> 32


def _vmem_limit_bytes():
    """Per-generation scoped-VMEM limit: 3/4 of physical, capped at 64 MiB.

    v5e/v6e (128 MiB physical) -> 64 MiB; v7x (64 MiB physical) -> 48 MiB.
    Falls back to the most constrained (v7x) figure if the query is unavailable.
    """
    cap = 64 << 20
    try:
        cap = int(pltpu.get_tpu_info().vmem_capacity_bytes)
    except Exception:  # pragma: no cover - conservative fallback off-TPU / older jax
        pass
    return min((cap * 3) // 4, 64 << 20)


def _pick_tile_lh(rank, l_h, l_w, out_dtype, vmem_limit_bytes):
    """Largest legal Lh tile whose REAL per-step VMEM footprint fits the budget.

    Accounts for (all figures are the padded VMEM layouts, not the dense HBM sizes):
      * 2x double-buffered out blocks       : R * tlh * ceil(Lw/128)*128 * out_bytes
      * 2x double-buffered wts_h blocks     : R * tlh * 128 * 4   (1 lane -> 128 pad)
      * ~2 tile-sized f32 temporaries (z, pre-store product)
      * fixed: 2x wts_w blocks (sublane-padded) + safety margin for Mosaic scratch.
    """
    out_bytes = jnp.dtype(out_dtype).itemsize
    sub_mult = _sublane_multiple(out_dtype)
    lw_pad = _round_up(l_w, 128)

    per_row = (2 * rank * lw_pad * out_bytes      # double-buffered out blocks
               + 2 * rank * 128 * 4               # double-buffered lane-padded wts_h
               + 2 * rank * lw_pad * 4)           # f32 temporaries (conservative)
    fixed = 2 * rank * 8 * lw_pad * 4 + (4 << 20)

    usable = max(vmem_limit_bytes - fixed, vmem_limit_bytes // 4)
    tlh = usable // max(per_row, 1)
    # Cap the out tile itself; beyond ~16 MiB the per-step overhead is already tiny.
    tlh = min(tlh, _TARGET_OUT_TILE_BYTES // max(rank * lw_pad * out_bytes, 1))

    if tlh >= l_h:
        # Whole Lh fits in one step.  Split into >=2 tiles when legal so the
        # "parallel" grid axis actually shards across both v7x TensorCores.
        if l_h >= 2 * sub_mult:
            half = _round_up((l_h + 1) // 2, sub_mult)
            if half < l_h:
                return half
        return l_h                                 # full dim -> always a legal block
    return max(sub_mult, (tlh // sub_mult) * sub_mult)


# ---------------------------------------------------------------------------
# Wrappers
# ---------------------------------------------------------------------------
def _rank_softmax_2d(w2d, out_dtype):
    # Tiny (R, L) parameter slab: single block (full array dims), lane-dense output.
    return pl.pallas_call(
        _rank_softmax_kernel,
        out_shape=jax.ShapeDtypeStruct(w2d.shape, out_dtype),
    )(w2d)


def outer_combining_weights(wts_h, wts_w, rank, output_shape, local_dim=None,
                            *, out_dtype=jnp.float32, tile_lh=None):
    """Pallas implementation of OuterCombiningWeights.forward().

    wts_h: (R, Lh, 1) or None     wts_w: (R, 1, Lw) or None
    returns:
      local_dim=None -> (1, R, Lh, Lw)
      local_dim=0    -> (1, R, Lh, 1)
      local_dim=1    -> (1, R, 1, Lw)
    """
    R = rank
    L_h, L_w = output_shape

    # local_dim branches: lane-dense 2-D softmax on the single parameter; the
    # reshapes below are free (contiguous) and reproduce the PyTorch shapes.
    if local_dim == 0:
        flat = _rank_softmax_2d(wts_h.astype(jnp.float32).reshape(R, L_h), out_dtype)
        return flat.reshape(1, R, L_h, 1)
    if local_dim == 1:
        flat = _rank_softmax_2d(wts_w.astype(jnp.float32).reshape(R, L_w), out_dtype)
        return flat.reshape(1, R, 1, L_w)

    # local_dim=None: full outer broadcast + rank softmax, tiled over Lh.
    wh3 = wts_h.astype(jnp.float32).reshape(R, L_h, 1)
    ww3 = wts_w.astype(jnp.float32).reshape(R, 1, L_w)

    vmem_limit = _vmem_limit_bytes()
    sub_mult = _sublane_multiple(out_dtype)
    out_bytes = jnp.dtype(out_dtype).itemsize

    if tile_lh is not None:
        tlh = min(int(tile_lh), L_h)
        if tlh < L_h and tlh % sub_mult != 0:
            raise ValueError(
                f"tile_lh={tlh} must be a multiple of {sub_mult} for "
                f"out_dtype={jnp.dtype(out_dtype).name} when it tiles Lh={L_h}")
    else:
        tlh = _pick_tile_lh(R, L_h, L_w, out_dtype, vmem_limit)
    num_tiles = int(pl.cdiv(L_h, tlh))

    out = pl.pallas_call(
        _outer_softmax_kernel,
        out_shape=jax.ShapeDtypeStruct((R, L_h, L_w), out_dtype),
        grid=(num_tiles,),
        in_specs=[
            # wts_h kept 3-D so the tiled Lh dim is a sublane dim; its 128x lane
            # padding in VMEM is accounted for in _pick_tile_lh (see TODO above).
            pl.BlockSpec((R, tlh, 1), lambda i: (0, i, 0)),
            # wts_w is tiny; the same full block every step.
            pl.BlockSpec((R, 1, L_w), lambda i: (0, 0, 0)),
        ],
        out_specs=pl.BlockSpec((R, tlh, L_w), lambda i: (0, i, 0)),
        compiler_params=pltpu.CompilerParams(
            dimension_semantics=("parallel",),      # shard Lh tiles across v7x TCs
            vmem_limit_bytes=vmem_limit,            # per-generation scoped VMEM
        ),
        cost_estimate=pl.CostEstimate(
            flops=int(4 * R * L_h * L_w),           # mul + rank-sum + divide + final mul
            transcendentals=int(R * (L_h + num_tiles * L_w)),  # per-tile eb recompute
            bytes_accessed=int(out_bytes * R * L_h * L_w + 4 * R * (L_h + L_w)),
        ),
    )(wh3, ww3)

    return out[None]  # (1, R, Lh, Lw)


# ---------------------------------------------------------------------------
# Pure-JAX reference mirroring the PyTorch forward
# ---------------------------------------------------------------------------
def _reference(wts_h, wts_w, local_dim=None):
    wh = wts_h if (local_dim is None or local_dim == 0) else 0.0
    ww = wts_w if (local_dim is None or local_dim == 1) else 0.0
    z = jnp.asarray(wh + ww)
    return jax.nn.softmax(z, axis=0)[None]


if __name__ == "__main__":
    key = jax.random.PRNGKey(0)

    configs = [
        # (rank, (Lh, Lw), local_dim, tile_lh, out_dtype)
        (4, (32, 128),  None, 8,    jnp.float32),   # explicit 4-step grid, lane-dense Lw
        (4, (256, 128), None, None, jnp.float32),   # auto tiling -> >=2 tiles (TC split)
        (4, (8, 16),    None, None, jnp.float32),   # tiny, single full block, narrow Lw
        (4, (32, 128),  None, None, jnp.bfloat16),  # bf16 out, 16-row sublane tiles
        (4, (8, 16),    0,    None, jnp.float32),   # local_dim=0 -> 2-D lane-dense kernel
        (4, (8, 16),    1,    None, jnp.float32),   # local_dim=1 -> 2-D lane-dense kernel
    ]

    ok = True
    for R, (L_h, L_w), local_dim, tile_lh, out_dtype in configs:
        key, kh, kw = jax.random.split(key, 3)
        # __init__-style deterministic parameters (ones * c / sqrt(R)) plus a
        # PRNGKey(0)-derived perturbation so the softmax is non-trivial.
        c = 1.0 / 2.0
        wts_h = (jnp.ones((R, L_h, 1), jnp.float32) * (c / math.sqrt(R))
                 + jax.random.uniform(kh, (R, L_h, 1), jnp.float32))
        wts_w = (jnp.ones((R, 1, L_w), jnp.float32) * (c / math.sqrt(R))
                 + jax.random.uniform(kw, (R, 1, L_w), jnp.float32))

        out = outer_combining_weights(wts_h, wts_w, R, (L_h, L_w), local_dim,
                                      out_dtype=out_dtype, tile_lh=tile_lh)
        out = jax.block_until_ready(out)
        ref = _reference(wts_h, wts_w, local_dim)

        if out_dtype == jnp.bfloat16:
            atol, rtol = 1e-2, 1e-2
        else:
            atol, rtol = 3e-6, 1e-6

        if out.shape != ref.shape:
            ok = False
            print(f"shape mismatch (R={R}, L=({L_h},{L_w}), d={local_dim}, "
                  f"dt={jnp.dtype(out_dtype).name}): {out.shape} vs {ref.shape}")
        elif not jnp.allclose(out.astype(jnp.float32), ref, atol=atol, rtol=rtol):
            ok = False
            err = float(jnp.max(jnp.abs(out.astype(jnp.float32) - ref)))
            print(f"value mismatch (R={R}, L=({L_h},{L_w}), d={local_dim}, "
                  f"dt={jnp.dtype(out_dtype).name}): max abs err {err:.3e}")

    if ok:
        print("KERNEL_OK")
</pallas_src>

<mosaic_0001>
module attributes {stable_mosaic.version = 11 : i64} {
  func.func @_outer_softmax_kernel(%arg0: i32, %arg1: memref<4x8x1xf32, #tpu.memory_space<vmem>>, %arg2: memref<4x1x128xf32, #tpu.memory_space<vmem>>, %arg3: memref<4x8x128xf32, #tpu.memory_space<vmem>>) attributes {dimension_semantics = [#tpu.dimension_semantics<parallel>], iteration_bounds = array<i64: 4>, scalar_prefetch = 0 : i64, scratch_operands = 0 : i64, tpu.core_type = #tpu.core_type<tc>, window_params = [{transform_indices = @transform_0, window_bounds = array<i64: 4, 8, 1>}, {pipeline_mode = #tpu.pipeline_mode<synchronous>, transform_indices = @transform_1, window_bounds = array<i64: 4, 1, 128>}, {transform_indices = @transform_2, window_bounds = array<i64: 4, 8, 128>}]} {
    %c0 = arith.constant 0 : index
    %c0_0 = arith.constant 0 : index
    %c0_1 = arith.constant 0 : index
    %0 = vector.load %arg1[%c0, %c0_0, %c0_1] : memref<4x8x1xf32, #tpu.memory_space<vmem>>, vector<4x8x1xf32>
    %c0_2 = arith.constant 0 : index
    %c0_3 = arith.constant 0 : index
    %c0_4 = arith.constant 0 : index
    %1 = vector.load %arg2[%c0_2, %c0_3, %c0_4] : memref<4x1x128xf32, #tpu.memory_space<vmem>>, vector<4x1x128xf32>
    %cst = arith.constant dense<0xFF800000> : vector<8x1xf32>
    %2 = vector.multi_reduction <maximumf>, %0, %cst [0] : vector<4x8x1xf32> to vector<8x1xf32>
    %3 = vector.shape_cast %2 : vector<8x1xf32> to vector<1x8x1xf32>
    %4 = vector.broadcast %3 : vector<1x8x1xf32> to vector<4x8x1xf32>
    %5 = arith.subf %0, %4 : vector<4x8x1xf32>
    %6 = math.exp %5 : vector<4x8x1xf32>
    %cst_5 = arith.constant dense<0xFF800000> : vector<1x128xf32>
    %7 = vector.multi_reduction <maximumf>, %1, %cst_5 [0] : vector<4x1x128xf32> to vector<1x128xf32>
    %8 = vector.shape_cast %7 : vector<1x128xf32> to vector<1x1x128xf32>
    %9 = vector.broadcast %8 : vector<1x1x128xf32> to vector<4x1x128xf32>
    %10 = arith.subf %1, %9 : vector<4x1x128xf32>
    %11 = math.exp %10 : vector<4x1x128xf32>
    %12 = vector.broadcast %6 : vector<4x8x1xf32> to vector<4x8x128xf32>
    %13 = vector.broadcast %11 : vector<4x1x128xf32> to vector<4x8x128xf32>
    %14 = arith.mulf %12, %13 : vector<4x8x128xf32>
    %cst_6 = arith.constant dense<0.000000e+00> : vector<8x128xf32>
    %15 = vector.multi_reduction <add>, %14, %cst_6 [0] : vector<4x8x128xf32> to vector<8x128xf32>
    %16 = vector.shape_cast %15 : vector<8x128xf32> to vector<1x8x128xf32>
    %17 = tpu.reciprocal %16 : vector<1x8x128xf32> -> vector<1x8x128xf32>
    %18 = vector.broadcast %17 : vector<1x8x128xf32> to vector<4x8x128xf32>
    %19 = arith.mulf %14, %18 : vector<4x8x128xf32>
    %c0_7 = arith.constant 0 : index
    %c0_8 = arith.constant 0 : index
    %c0_9 = arith.constant 0 : index
    %20 = vector.load %arg3[%c0_7, %c0_8, %c0_9] : memref<4x8x128xf32, #tpu.memory_space<vmem>>, vector<4x8x128xf32>
    tpu.vector_store %arg3[%c0_7, %c0_8, %c0_9], %19 {strides = array<i32>} : memref<4x8x128xf32, #tpu.memory_space<vmem>>, vector<4x8x128xf32>,
    return
  }
  func.func @transform_0(%arg0: i32) -> (i32, i32, i32) {
    %c0_i32 = arith.constant 0 : i32
    %c0_i32_0 = arith.constant 0 : i32
    %c0_i32_1 = arith.constant 0 : i32
    return %c0_i32, %arg0, %c0_i32_0 : i32, i32, i32
  }
  func.func @transform_1(%arg0: i32) -> (i32, i32, i32) {
    %c0_i32 = arith.constant 0 : i32
    %c0_i32_0 = arith.constant 0 : i32
    %c0_i32_1 = arith.constant 0 : i32
    %c0_i32_2 = arith.constant 0 : i32
    return %c0_i32, %c0_i32_0, %c0_i32_1 : i32, i32, i32
  }
  func.func @transform_2(%arg0: i32) -> (i32, i32, i32) {
    %c0_i32 = arith.constant 0 : i32
    %c0_i32_0 = arith.constant 0 : i32
    %c0_i32_1 = arith.constant 0 : i32
    return %c0_i32, %arg0, %c0_i32_0 : i32, i32, i32
  }
}

</mosaic_0001>

<bundles_post_ra>
// kernel: tpu_custom_call.1
= control target key start
LH: loop header
LB: loop body
LE: loop exit
PB: predicated region body
PF: predicated region fallthrough
CT: control target
= control target key end

     0   :  { %7 = vsyncpa [#allocation4], 0  ;;  %s664_s0 = inlined_call_operand.vmem [shape: f32[4,32,1], index: 0, kind: input, shape index: {}]   ;;  %s665_s1 = inlined_call_operand.vmem [shape: f32[4,1,128], index: 1, kind: input, shape index: {}]   ;;  %s666_s2 = inlined_call_operand.hbm [shape: f32[4,32,128], index: 2, kind: output, shape index: {}]  }
   0x1   :  { %9 = vsyncpa [#allocation4 + $0x1], 0  ;;  %s539_s9 = smov 0   ;;  %s541_s10 = smov 0  }
   0x2   :  { %s543_s11 = smov 0   ;;  %s545_s12 = smov 0  }
   0x3 LB: > { %s379_s13 = sadd.s32 4294967295, %s517_s12   ;;  %s380_s14 = sadd.s32 4294967294, %s517_s12   ;;  %s517_s12 = sphi %s545_s12, %s672_s12   ;;  %s513_s11 = sphi %s543_s11, %s671_s11   ;;  %s509_s10 = sphi %s541_s10, %s670_s10   ;;  %s505_s9 = sphi %s539_s9, %s669_s9  }
   0x4   : > { %s562_s15 = sadd.s32 1, %s517_s12   ;;  %s22_s16 = sadd.s32 1, %s513_s11 }
   0x5   : > { %s19_s17 = ssub.s32 %s517_s12, %s562_s15  ;;  %p29_p0 = scmp.ne.s32.totalorder %s513_s11, %s509_s10 }
   0x6   : > { %p20_p1 = scmp.eq.s32.totalorder %s19_s17, 0  ;;  %p30_p2 = scmp.eq.s32.totalorder %s517_s12, 0 }
   0x7   : > { %p80_p3 = scmp.eq.s32.totalorder %s379_s13, 3  ;;  %p85_p4 = scmp.ne.s32.totalorder %s509_s10, %s505_s9 }
   0x8   : > { %s575_s18 = scalar_select %p20_p1, %s513_s11, %s22_s16  }
   0x9   : > { %p31_p5 = por %p30_p2, %p29_p0  ;;  %p577_p6 = por %p80_p3, %p29_p0 }
   0xa   : > { %p86_p7 = scmp.eq.s32.totalorder %s380_s14, 3  ;;  %p382_p9 = scmp.ge.s32.totalorder %s517_s12, 4 }
   0xc   : > { %p581_p8 = por %p86_p7, %p85_p4  ;;  %105 = sbr.rel (%p382_p9) target bundleno = 27 (0x1b), region = 20 }
  0x13   : > { %108 = sbr.rel (!%p31_p5) target bundleno = 27 (0x1b), region = 24  ;;  %s110_s21 = sand.u32 (%p31_p5), 1, %s513_s11  }
  0x14   : > { %s384_s22 = sshll.u32 (%p31_p5), %s517_s12, 3  ;;  %s383_s23 = sshll.u32 (%p31_p5), %s110_s21, 5 }
  0x15   : > { %s114_s26 = scalar_lea.vmem (%p31_p5), %s664_s0, %s384_s22  ;;  %s112_s27 = scalar_lea.vmem (%p31_p5), [#allocation2], %s383_s23 }
  0x16   : > { %v148_v0 = vld [vmem:[%s114_s26] sm:$0xff] (%p31_p5) }
  0x17   : > { %v150_v1 = vld [vmem:[%s114_s26 + $0x20] sm:$0xff] (%p31_p5)  ;;  %149 = vst [vmem:[%s112_s27] sm:$0xff] (%p31_p5), %v148_v0 }
  0x18   : > { %v152_v2 = vld [vmem:[%s114_s26 + $0x40] sm:$0xff] (%p31_p5)  ;;  %151 = vst [vmem:[%s112_s27 + $0x8] sm:$0xff] (%p31_p5), %v150_v1 }
  0x19   : > { %153 = vst [vmem:[%s112_s27 + $0x10] sm:$0xff] (%p31_p5), %v152_v2  ;;  %v154_v3 = vld [vmem:[%s114_s26 + $0x60] sm:$0xff] (%p31_p5) }
  0x1a   : > { %155 = vst [vmem:[%s112_s27 + $0x18] sm:$0xff] %v154_v3 }
  0x1b PF: > { %p385_p10 = scmp.ge.s32.totalorder %s517_s12, 1  ;;  %p160_p11 = scmp.lt.s32.totalorder %s517_s12, 5 }
  0x1d   : > { %p161_p12 = pnand %p385_p10, %p160_p11 }
  0x1e   : > { %s167_s28 = sand.u32 (!%p161_p12), 1, %s509_s10   ;;  %v519_v4 = vmov (!%p161_p12), 0   ;;  %vm196_vm0 = vcmask (!%p161_p12), 7168   ;;  %v216_v28 = vlaneseq (!%p161_p12)  ;;  %v192_v29 = vld [vmem:[%s665_s1] sm:$0x1] (!%p161_p12)  ;;  %s389_s22 = sshll.u32 (!%p161_p12), %s379_s13, 7 }
  0x1f   : > { %164 = sbr.rel (%p161_p12) target bundleno = 227 (0xe3), region = 62  ;;  %436 = vset.pattern.permute.xlu1 (!%p161_p12), %v519_v4  ;;  %435 = vset.pattern.permute.xlu0 (!%p161_p12), %v519_v4  ;;  %s596_s29 = sshll.u32 (!%p161_p12), %s167_s28, 5  ;;  %v193_v30 = vld [vmem:[%s665_s1 + $0x1] sm:$0x1] (!%p161_p12)  ;;  %v194_v31 = vld [vmem:[%s665_s1 + $0x2] sm:$0x1] (!%p161_p12) }
  0x20   : > { %s169_s30 = scalar_lea.vmem (!%p161_p12), [#allocation2], %s596_s29  ;;  %v195_v32 = vld [vmem:[%s665_s1 + $0x3] sm:$0x1] (!%p161_p12)  ;;  %vm218_vm1 = vcmp.lt.s32.totalorder (!%p161_p12), %v216_v28, 128  ;;  %v264_v48 = vshrl.u32 (!%p161_p12), %v216_v28, 7  ;;  %s187_s17 = scalar_lea.vmem (!%p161_p12), [#allocation3], %s596_s29 }
  0x21   : > { %v188_v5 = vld [vmem:[%s169_s30] sm:$0xff] (!%p161_p12)  ;;  %v189_v6 = vld [vmem:[%s169_s30 + $0x8] sm:$0xff] (!%p161_p12)  ;;  %v190_v7 = vld [vmem:[%s169_s30 + $0x10] sm:$0xff] (!%p161_p12)  ;;  %v220_v33 = vsel (!%p161_p12), %vm218_vm1, %v192_v29, -inf  ;;  %v221_v34 = vsel (!%p161_p12), %vm218_vm1, %v193_v30, -inf  ;;  %v222_v35 = vsel (!%p161_p12), %vm218_vm1, %v194_v31, -inf  ;;  %s619_s25 = scalar_lea.hbm (!%p161_p12), %s666_s2, %s389_s22 }
  0x22   : > { %v191_v8 = vld [vmem:[%s169_s30 + $0x18] sm:$0xff] (!%p161_p12)  ;;  %v197_v9 = vsel (!%p161_p12), %vm196_vm0, %v188_v5, -inf  ;;  %v198_v10 = vsel (!%p161_p12), %vm196_vm0, %v189_v6, -inf  ;;  %v199_v11 = vsel (!%p161_p12), %vm196_vm0, %v190_v7, -inf  ;;  %v223_v36 = vsel (!%p161_p12), %vm218_vm1, %v195_v32, -inf  ;;  %s312_s21 = sshll.u32 (!%p161_p12), %s187_s17, 4  ;;  %s614_s21 = int_to_ptr.vmem [resolvable:$true] %s312_s21 }
  0x23   : > { %v200_v12 = vsel (!%p161_p12), %vm196_vm0, %v191_v8, -inf  ;;  %v201_v13 = vmax.f32 (!%p161_p12), %v197_v9, %v198_v10  ;;  %v224_v37 = vmax.f32 (!%p161_p12), %v220_v33, %v221_v34  ;;  %v225_v38 = vmax.f32 (!%p161_p12), %v222_v35, %v223_v36  ;;  %s623_s13 = scalar_lea.sflag (!%p161_p12), [#allocation4], %s167_s28  ;;  %s455_s26 = scalar_lea.vmem (!%p161_p12), %s614_s21, 512 }
  0x24   : > { %v202_v14 = vmax.f32 (!%p161_p12), %v199_v11, %v200_v12  ;;  %v265_v50 = vsub.s32 (!%p161_p12), 0, %v264_v48  ;;  %p456_p13 = scmp.ne.s32.totalorder (!%p161_p12), %s614_s21, %s455_s26  ;;  %s520_s27 = smov (!%p161_p12), [#allocation3]  }
  0x25   : > { %v226_v39 = vmax.f32 (!%p161_p12), %v224_v37, %v225_v38  ;;  %s459_s29 = sshll.u32 (!%p161_p12), %s520_s27, 4  ;;  %s460_s29 = int_to_ptr.vmem [resolvable:$false] %s459_s29 }
  0x26   : > { %v203_v15 = vmax.f32 %v201_v13, %v202_v14  ;;  %p457_p0 = pnand %p456_p13, %p577_p6  ;;  %s461_s30 = scalar_lea.vmem %s460_s29, 1024 }
  0x27   : > { %v227_v40 = vsub.f32 %v192_v29, %v226_v39  ;;  %v228_v41 = vsub.f32 %v193_v30, %v226_v39  ;;  %v229_v42 = vsub.f32 %v194_v31, %v226_v39  ;;  %v230_v44 = vsub.f32 %v195_v32, %v226_v39  ;;  %p462_p2 = scmp.lt.s32.totalorder %s614_s21, %s460_s29  ;;  %p463_p3 = scmp.lt.s32.totalorder %s461_s30, %s455_s26 }
  0x28   : > { %v206_v16 = vsub.f32 %v190_v7, %v203_v15  ;;  %v207_v17 = vsub.f32 %v191_v8, %v203_v15  ;;  %v204_v18 = vsub.f32 %v188_v5, %v203_v15  ;;  %v205_v19 = vsub.f32 %v189_v6, %v203_v15  ;;  %p458_p1 = pneg %p457_p0 }
  0x29   : > { %v231_v43 = vmul.f32 1.442695, %v227_v40  ;;  %v233_v45 = vmul.f32 1.442695, %v228_v41  ;;  %v235_v46 = vmul.f32 1.442695, %v229_v42  ;;  %p464_p4 = por %p463_p3, %p462_p2 }
  0x2a   : > { %v212_v20 = vmul.f32 1.442695, %v206_v16  ;;  %v214_v21 = vmul.f32 1.442695, %v207_v17  ;;  %v208_v22 = vmul.f32 1.442695, %v204_v18 }
  0x2b   : > { %v210_v23 = vmul.f32 1.442695, %v205_v19  ;;  %v237_v47 = vmul.f32 1.442695, %v230_v44  ;;  %p465_p5 = pnand %p464_p4, %p458_p1 }
  0x2c   : > { %437 = vpow2.f32 %v212_v20 }
  0x2d   : > { %439 = vpow2.f32 %v214_v21 }
  0x2e   : > { %441 = vpow2.f32 %v208_v22 }
  0x2f   : > { %443 = vpow2.f32 %v210_v23 }
  0x30   : > { %445 = vpow2.f32 %v231_v43 }
  0x31   : > { %447 = vpow2.f32 %v233_v45 }
  0x32   : > { %449 = vpow2.f32 %v235_v46 }
  0x33   : > { %451 = vpow2.f32 %v237_v47 }
  0x36   : > { %v438_v24 = vpop.eup %437 }
  0x37   : > { %251 = vperm.xlu1 %436, %v438_v24   ;;  %v440_v25 = vpop.eup %439 }
  0x38   : > { %v442_v26 = vpop.eup %441 }
  0x39   : > { %241 = vperm.xlu0 %435, %v442_v26   ;;  %v444_v27 = vpop.eup %443 }
  0x3a   : > { %v446_v49 = vpop.eup %445 }
  0x3b   : > { %256 = vperm.xlu1 %436, %v440_v25   ;;  %v448_v51 = vpop.eup %447  ;;  %v266_v55 = vrot.slane %v446_v49, %v265_v50 }
  0x3c   : > { %v450_v52 = vpop.eup %449  ;;  %v270_v56 = vrot.slane %v448_v51, %v265_v50 }
  0x3d   : > { %246 = vperm.xlu0 %435, %v444_v27   ;;  %v452_v57 = vpop.eup %451  ;;  %v274_v58 = vrot.slane %v450_v52, %v265_v50 }
  0x3e   : > { %v278_v61 = vrot.slane %v452_v57, %v265_v50 }
  0xb6   : > { %v252_v53 = vpop.permute.xlu1 %251 }
  0xb7   : > { %v285_v0 = vmul.f32 %v274_v58, %v252_v53 }
  0xb8   : > { %v242_v54 = vpop.permute.xlu0 %241 }
  0xb9   : > { %v283_v60 = vmul.f32 %v266_v55, %v242_v54 }
  0xba   : > { %v257_v63 = vpop.permute.xlu1 %256 }
  0xbb   : > { %v286_v2 = vmul.f32 %v278_v61, %v257_v63 }
  0xbc   : > { %v247_v59 = vpop.permute.xlu0 %246 }
  0xbd   : > { %v284_v62 = vmul.f32 %v270_v56, %v247_v59 }
  0xbf   : > { %v287_v1 = vadd.f32 %v284_v62, %v283_v60 }
  0xc1   : > { %v288_v3 = vadd.f32 %v287_v1, %v285_v0 }
  0xc3   : > { %v289_v4 = vadd.f32 %v288_v3, %v286_v2 }
  0xc5   : > { %453 = vrcp.f32 %v289_v4 }
  0xcf   : > { %v454_v5 = vpop.eup %453 }
  0xd0   : > { %v291_v6 = vmul.f32 %v454_v5, %v283_v60  ;;  %v292_v7 = vmul.f32 %v454_v5, %v284_v62  ;;  %v293_v8 = vmul.f32 %v454_v5, %v285_v0  ;;  %v294_v9 = vmul.f32 %v454_v5, %v286_v2 }
  0xd2   : > { %295 = vst [vmem:[%s187_s17] sm:$0xff] %v291_v6  ;;  %296 = vst [vmem:[%s187_s17 + $0x8] sm:$0xff] %v292_v7 }
  0xd3   : > { %297 = vst [vmem:[%s187_s17 + $0x10] sm:$0xff] %v293_v8  ;;  %298 = vst [vmem:[%s187_s17 + $0x18] sm:$0xff] %v294_v9 }
  0xd4   : > { %468 = shalt.err (!%p465_p5)
}
  0xd5   : > { %s469_s28 = scalar_lea.hbm %s619_s25, 512  ;;  %s473_s5 = scalar_lea.hbm %s666_s2, 2048 }
  0xd6   : > { %p470_p7 = scmp.ne.s32.totalorder %s619_s25, %s469_s28  ;;  %p474_p11 = scmp.lt.u32.totalorder %s619_s25, %s666_s2 }
  0xd7   : > { %p475_p12 = scmp.lt.u32.totalorder %s473_s5, %s469_s28  ;;  %p477_p0 = scmp.lt.u32.totalorder %s469_s28, %s619_s25 }
  0xd8   : > { %p471_p9 = pnand %p470_p7, %p577_p6 }
  0xd9   : > { %p476_p13 = por %p475_p12, %p474_p11 }
  0xda   : > { %p472_p10 = pneg %p471_p9 }
  0xdb   : > { %p478_p1 = por %p477_p0, %p476_p13 }
  0xdd   : > { %p479_p2 = pnand %p478_p1, %p472_p10 }
  0xdf   : > { %482 = shalt.err (!%p479_p2)
}
  0xe0   : > { %s521_s8 = smov 128   ;;  %s522_s14 = smov 512  }
  0xe1   : > { %s523_s16 = smov 8  }
  0xe2   : > { %392 = dma.vmem_to_hbm [thread:$0]  (%p577_p6), %s614_s21, 512, %s619_s25, %s623_s13, %s521_s8, %s522_s14, %s523_s16  }
  0xe3 PF: > { %p398_p3 = scmp.ge.s32.totalorder %s517_s12, 2  ;;  %s327_s17 = sand.u32 1, %s505_s9  }
  0xe4   : > { %s328_s22 = scalar_lea.sflag [#allocation4], %s327_s17 }
  0xe5   : > { %p395_p4 = pnand %p398_p3, %p581_p8 }
  0xe7   : > { %500 = dma.done.wait (!%p395_p4), %s328_s22, 512  }
  0xe8   : > { %502 = vsyncadd (!%p395_p4), %s328_s22, 4294966784  ;;  %p12_p5 = scmp.ge.s32.totalorder %s562_s15, 6   ;;  %s669_s9 = smov %s509_s10 }
  0xe9   : > { %s670_s10 = smov %s513_s11  ;;  %s671_s11 = smov %s575_s18 }
  0xea   : > { %s672_s12 = smov %s562_s15  ;;  %14 = sbr.rel (!%p12_p5) target bundleno = 3 (0x3), region = 106 }
  0xf1   :  { %333 = vsyncpa [#allocation4], 1 }
  0xf2   :  { %335 = vsyncpa [#allocation4 + $0x1], 1 }

</bundles_post_ra>
